<compile_context>
chip_gen: v7x
topology: tpu7x:2x2x1
jax: 0.10.0
libtpu: 0.0.40
codegen_flags: <defaults>
</compile_context>

<pallas_src>
import math

import jax
import jax.numpy as jnp
from jax.experimental import pallas as pl
from jax.experimental.pallas import tpu as pltpu


def _ffn_kernel(x_ref, w1_ref, b1_ref, w3_ref, b3_ref, w2_ref, b2_ref,
                o_ref, acc_ref):
    k = pl.program_id(1)

    @pl.when(k == 0)
    def _():
        acc_ref[...] = jnp.zeros_like(acc_ref)

    x = x_ref[...]                                                   # (tm, d_model)

    # gate / up projections for this hidden tile (MXU, f32 accumulation)
    h1 = jnp.dot(x, w1_ref[...], preferred_element_type=jnp.float32) + b1_ref[...]
    h3 = jnp.dot(x, w3_ref[...], preferred_element_type=jnp.float32) + b3_ref[...]

    # SwiGLU in f32 (EUP handles the sigmoid's exp), cast to input dtype for
    # the second MXU pass so bf16 inputs keep the fast MXU path.
    h = ((h1 * jax.nn.sigmoid(h1)) * h3).astype(x.dtype)             # (tm, th)

    # partial down-projection, accumulated across hidden tiles
    acc_ref[...] += jnp.dot(h, w2_ref[...], preferred_element_type=jnp.float32)

    @pl.when(k == pl.num_programs(1) - 1)
    def _():
        o_ref[...] = (acc_ref[...] + b2_ref[...]).astype(o_ref.dtype)


def _round_up(x, m):
    return ((x + m - 1) // m) * m


def _pick_hidden_tile(hidden, target, align=128):
    """Largest tile <= target that divides hidden (prefer multiples of `align`)."""
    t = min(target, hidden)
    if hidden % t == 0:
        return t
    best = None
    d = align
    while d <= t:
        if hidden % d == 0:
            best = d
        d += align
    return best if best is not None else hidden


def feed_forward(x, w1, b1, w2, b2, w3, b3, *, tm=256, th=512):
    """x: (..., d_model).  w1/w3: (d_model, hidden), w2: (hidden, d_model)."""
    d_model = x.shape[-1]
    hidden = w1.shape[1]
    lead = x.shape[:-1]

    xm = x.reshape(-1, d_model)
    M = xm.shape[0]

    # --- tile selection -----------------------------------------------------
    # Token tile: multiple of 16 (valid for f32 and bf16 sublane minimums),
    # clamped for tiny M; pad the token dimension up to a multiple of it.
    tm_eff = min(_round_up(max(tm, 16), 16), _round_up(M, 16))
    M_pad = _round_up(M, tm_eff)
    if M_pad != M:
        xm = jnp.pad(xm, ((0, M_pad - M), (0, 0)))

    # Hidden tile: divides hidden; th=512 keeps double-buffered bf16 weight
    # tiles well inside v7x's 64 MiB VMEM at d_model=4096.
    th_eff = _pick_hidden_tile(hidden, th)
    n_k = hidden // th_eff

    # Biases as (1, N) rows so they broadcast cleanly from VMEM.
    b1r = b1.reshape(1, hidden)
    b3r = b3.reshape(1, hidden)
    b2r = b2.reshape(1, d_model)

    # --- VMEM budget (double-buffered tiles + f32 accumulator + margin) ------
    itemsize = jnp.dtype(x.dtype).itemsize
    weight_tile = (2 * d_model * th_eff + th_eff * d_model) * itemsize
    io_tile = 2 * tm_eff * d_model * itemsize
    bias_tile = (2 * th_eff + d_model) * itemsize
    acc_bytes = tm_eff * d_model * 4
    vmem_bytes = int(min(2 * (weight_tile + io_tile + bias_tile)
                         + acc_bytes + (16 << 20), 100 << 20))

    out = pl.pallas_call(
        _ffn_kernel,
        out_shape=jax.ShapeDtypeStruct((M_pad, d_model), x.dtype),
        grid_spec=pltpu.PrefetchScalarGridSpec(
            num_scalar_prefetch=0,
            grid=(M_pad // tm_eff, n_k),                  # k (reduction) innermost
            in_specs=[
                pl.BlockSpec((tm_eff, d_model), lambda i, k: (i, 0)),   # x tile (k-invariant)
                pl.BlockSpec((d_model, th_eff), lambda i, k: (0, k)),   # w1 tile
                pl.BlockSpec((1, th_eff),       lambda i, k: (0, k)),   # b1 tile
                pl.BlockSpec((d_model, th_eff), lambda i, k: (0, k)),   # w3 tile
                pl.BlockSpec((1, th_eff),       lambda i, k: (0, k)),   # b3 tile
                pl.BlockSpec((th_eff, d_model), lambda i, k: (k, 0)),   # w2 tile
                pl.BlockSpec((1, d_model),      lambda i, k: (0, 0)),   # b2
            ],
            out_specs=pl.BlockSpec((tm_eff, d_model), lambda i, k: (i, 0)),
            scratch_shapes=[pltpu.VMEM((tm_eff, d_model), jnp.float32)],
        ),
        compiler_params=pltpu.CompilerParams(
            dimension_semantics=("parallel", "arbitrary"),
            vmem_limit_bytes=vmem_bytes,
        ),
    )(xm, w1, b1r, w3, b3r, w2, b2r)

    if M_pad != M:
        out = out[:M]
    return out.reshape(*lead, d_model)


def init_params(key, d_model, hidden, dtype=jnp.float32):
    """Deterministic init mimicking nn.Linear's uniform(-1/sqrt(fan_in), ...)."""
    k1, k2, k3, k4, k5, k6 = jax.random.split(key, 6)
    lim1 = 1.0 / (d_model ** 0.5)   # fan_in = d_model for w1, w3
    lim2 = 1.0 / (hidden ** 0.5)    # fan_in = hidden for w2
    # stored as (in, out) == transpose of torch Linear weight
    w1 = jax.random.uniform(k1, (d_model, hidden), dtype, -lim1, lim1)
    b1 = jax.random.uniform(k2, (hidden,), dtype, -lim1, lim1)
    w3 = jax.random.uniform(k3, (d_model, hidden), dtype, -lim1, lim1)
    b3 = jax.random.uniform(k4, (hidden,), dtype, -lim1, lim1)
    w2 = jax.random.uniform(k5, (hidden, d_model), dtype, -lim2, lim2)
    b2 = jax.random.uniform(k6, (d_model,), dtype, -lim2, lim2)
    return w1, b1, w2, b2, w3, b3


def _reference(x, w1, b1, w2, b2, w3, b3):
    xf = x.astype(jnp.float32)
    h1 = xf @ w1.astype(jnp.float32) + b1.astype(jnp.float32)
    h3 = xf @ w3.astype(jnp.float32) + b3.astype(jnp.float32)
    h = (h1 * jax.nn.sigmoid(h1)) * h3
    return h @ w2.astype(jnp.float32) + b2.astype(jnp.float32)


if __name__ == "__main__":
    key = jax.random.PRNGKey(0)
    d_model, hidden = 32, 64
    batch, seq = 2, 8

    kp, kx = jax.random.split(key)

    # --- f32 check (exact tolerance) -----------------------------------------
    w1, b1, w2, b2, w3, b3 = init_params(kp, d_model, hidden, jnp.float32)
    x = jax.random.normal(kx, (batch, seq, d_model), jnp.float32)
    y = jax.block_until_ready(feed_forward(x, w1, b1, w2, b2, w3, b3))
    y_ref = _reference(x, w1, b1, w2, b2, w3, b3)
    assert y.shape == (batch, seq, d_model)
    assert jnp.allclose(y, y_ref, atol=1e-5, rtol=1e-5)

    # --- non-divisible token count exercises the padding path ---------------
    x_odd = jax.random.normal(kx, (3, 5, d_model), jnp.float32)
    y_odd = jax.block_until_ready(feed_forward(x_odd, w1, b1, w2, b2, w3, b3))
    y_odd_ref = _reference(x_odd, w1, b1, w2, b2, w3, b3)
    assert y_odd.shape == (3, 5, d_model)
    assert jnp.allclose(y_odd, y_odd_ref, atol=1e-5, rtol=1e-5)

    # --- bf16 path (looser tolerance) ----------------------------------------
    w1b, b1b, w2b, b2b, w3b, b3b = (a.astype(jnp.bfloat16)
                                    for a in (w1, b1, w2, b2, w3, b3))
    xb = x.astype(jnp.bfloat16)
    yb = jax.block_until_ready(feed_forward(xb, w1b, b1b, w2b, b2b, w3b, b3b))
    yb_ref = _reference(xb, w1b, b1b, w2b, b2b, w3b, b3b)
    assert yb.shape == (batch, seq, d_model)
    assert jnp.allclose(yb.astype(jnp.float32), yb_ref, atol=5e-2, rtol=5e-2)

    print("KERNEL_OK")
</pallas_src>

<mosaic_0001>
module attributes {stable_mosaic.version = 11 : i64} {
  func.func @_ffn_kernel(%arg0: i32, %arg1: i32, %arg2: memref<16x32xf32, #tpu.memory_space<vmem>>, %arg3: memref<32x64xf32, #tpu.memory_space<vmem>>, %arg4: memref<1x64xf32, #tpu.memory_space<vmem>>, %arg5: memref<32x64xf32, #tpu.memory_space<vmem>>, %arg6: memref<1x64xf32, #tpu.memory_space<vmem>>, %arg7: memref<64x32xf32, #tpu.memory_space<vmem>>, %arg8: memref<1x32xf32, #tpu.memory_space<vmem>>, %arg9: memref<16x32xf32, #tpu.memory_space<vmem>>, %arg10: memref<16x32xf32, #tpu.memory_space<vmem>>) attributes {dimension_semantics = [#tpu.dimension_semantics<parallel>, #tpu.dimension_semantics<arbitrary>], iteration_bounds = array<i64: 1, 1>, scalar_prefetch = 0 : i64, scratch_operands = 1 : i64, tpu.core_type = #tpu.core_type<tc>, window_params = [{transform_indices = @transform_0, window_bounds = array<i64: 16, 32>}, {transform_indices = @transform_1, window_bounds = array<i64: 32, 64>}, {transform_indices = @transform_2, window_bounds = array<i64: 1, 64>}, {transform_indices = @transform_3, window_bounds = array<i64: 32, 64>}, {transform_indices = @transform_4, window_bounds = array<i64: 1, 64>}, {transform_indices = @transform_5, window_bounds = array<i64: 64, 32>}, {pipeline_mode = #tpu.pipeline_mode<synchronous>, transform_indices = @transform_6, window_bounds = array<i64: 1, 32>}, {transform_indices = @transform_7, window_bounds = array<i64: 16, 32>}]} {
    %c0_i32 = arith.constant 0 : i32
    %0 = arith.cmpi eq, %arg1, %c0_i32 : i32
    %1 = arith.extui %0 : i1 to i32
    %c0_i32_0 = arith.constant 0 : i32
    %2 = arith.cmpi ne, %1, %c0_i32_0 : i32
    scf.if %2 {
      %cst_21 = arith.constant 0.000000e+00 : f32
      %29 = vector.broadcast %cst_21 : f32 to vector<16x32xf32>
      %c0_22 = arith.constant 0 : index
      %c0_23 = arith.constant 0 : index
      %30 = vector.load %arg10[%c0_22, %c0_23] : memref<16x32xf32, #tpu.memory_space<vmem>>, vector<16x32xf32>
      tpu.vector_store %arg10[%c0_22, %c0_23], %29 {strides = array<i32>} : memref<16x32xf32, #tpu.memory_space<vmem>>, vector<16x32xf32>,
    } else {
    }
    %c0 = arith.constant 0 : index
    %c0_1 = arith.constant 0 : index
    %3 = vector.load %arg2[%c0, %c0_1] : memref<16x32xf32, #tpu.memory_space<vmem>>, vector<16x32xf32>
    %c0_2 = arith.constant 0 : index
    %c0_3 = arith.constant 0 : index
    %4 = vector.load %arg3[%c0_2, %c0_3] : memref<32x64xf32, #tpu.memory_space<vmem>>, vector<32x64xf32>
    %cst = arith.constant dense<0.000000e+00> : vector<16x64xf32>
    %5 = tpu.matmul %3, %4, %cst {dimension_numbers = #tpu.dot_dimension_numbers<[1], [0], [0], [1], [0, 0, 1, 1], [], []>} : vector<16x32xf32>, vector<32x64xf32>, vector<16x64xf32> -> vector<16x64xf32>
    %c0_4 = arith.constant 0 : index
    %c0_5 = arith.constant 0 : index
    %6 = vector.load %arg4[%c0_4, %c0_5] : memref<1x64xf32, #tpu.memory_space<vmem>>, vector<1x64xf32>
    %7 = vector.broadcast %6 : vector<1x64xf32> to vector<16x64xf32>
    %8 = arith.addf %5, %7 : vector<16x64xf32>
    %c0_6 = arith.constant 0 : index
    %c0_7 = arith.constant 0 : index
    %9 = vector.load %arg5[%c0_6, %c0_7] : memref<32x64xf32, #tpu.memory_space<vmem>>, vector<32x64xf32>
    %cst_8 = arith.constant dense<0.000000e+00> : vector<16x64xf32>
    %10 = tpu.matmul %3, %9, %cst_8 {dimension_numbers = #tpu.dot_dimension_numbers<[1], [0], [0], [1], [0, 0, 1, 1], [], []>} : vector<16x32xf32>, vector<32x64xf32>, vector<16x64xf32> -> vector<16x64xf32>
    %c0_9 = arith.constant 0 : index
    %c0_10 = arith.constant 0 : index
    %11 = vector.load %arg6[%c0_9, %c0_10] : memref<1x64xf32, #tpu.memory_space<vmem>>, vector<1x64xf32>
    %12 = vector.broadcast %11 : vector<1x64xf32> to vector<16x64xf32>
    %13 = arith.addf %10, %12 : vector<16x64xf32>
    %14 = arith.negf %8 : vector<16x64xf32>
    %15 = math.exp %14 : vector<16x64xf32>
    %cst_11 = arith.constant 1.000000e+00 : f32
    %16 = vector.broadcast %cst_11 : f32 to vector<16x64xf32>
    %17 = arith.addf %16, %15 : vector<16x64xf32>
    %18 = arith.divf %16, %17 : vector<16x64xf32>
    %19 = arith.mulf %8, %18 : vector<16x64xf32>
    %20 = arith.mulf %19, %13 : vector<16x64xf32>
    %c0_12 = arith.constant 0 : index
    %c0_13 = arith.constant 0 : index
    %21 = vector.load %arg10[%c0_12, %c0_13] : memref<16x32xf32, #tpu.memory_space<vmem>>, vector<16x32xf32>
    %c0_14 = arith.constant 0 : index
    %c0_15 = arith.constant 0 : index
    %22 = vector.load %arg7[%c0_14, %c0_15] : memref<64x32xf32, #tpu.memory_space<vmem>>, vector<64x32xf32>
    %cst_16 = arith.constant dense<0.000000e+00> : vector<16x32xf32>
    %23 = tpu.matmul %20, %22, %cst_16 {dimension_numbers = #tpu.dot_dimension_numbers<[1], [0], [0], [1], [0, 0, 1, 1], [], []>} : vector<16x64xf32>, vector<64x32xf32>, vector<16x32xf32> -> vector<16x32xf32>
    %24 = arith.addf %21, %23 : vector<16x32xf32>
    %c0_17 = arith.constant 0 : index
    %c0_18 = arith.constant 0 : index
    %25 = vector.load %arg10[%c0_17, %c0_18] : memref<16x32xf32, #tpu.memory_space<vmem>>, vector<16x32xf32>
    tpu.vector_store %arg10[%c0_17, %c0_18], %24 {strides = array<i32>} : memref<16x32xf32, #tpu.memory_space<vmem>>, vector<16x32xf32>,
    %c0_i32_19 = arith.constant 0 : i32
    %26 = arith.cmpi eq, %arg1, %c0_i32_19 : i32
    %27 = arith.extui %26 : i1 to i32
    %c0_i32_20 = arith.constant 0 : i32
    %28 = arith.cmpi ne, %27, %c0_i32_20 : i32
    scf.if %28 {
      %c0_21 = arith.constant 0 : index
      %c0_22 = arith.constant 0 : index
      %29 = vector.load %arg10[%c0_21, %c0_22] : memref<16x32xf32, #tpu.memory_space<vmem>>, vector<16x32xf32>
      %c0_23 = arith.constant 0 : index
      %c0_24 = arith.constant 0 : index
      %30 = vector.load %arg8[%c0_23, %c0_24] : memref<1x32xf32, #tpu.memory_space<vmem>>, vector<1x32xf32>
      %31 = vector.broadcast %30 : vector<1x32xf32> to vector<16x32xf32>
      %32 = arith.addf %29, %31 : vector<16x32xf32>
      %c0_25 = arith.constant 0 : index
      %c0_26 = arith.constant 0 : index
      %33 = vector.load %arg9[%c0_25, %c0_26] : memref<16x32xf32, #tpu.memory_space<vmem>>, vector<16x32xf32>
      tpu.vector_store %arg9[%c0_25, %c0_26], %32 {strides = array<i32>} : memref<16x32xf32, #tpu.memory_space<vmem>>, vector<16x32xf32>,
    } else {
    }
    return
  }
  func.func @transform_0(%arg0: i32, %arg1: i32) -> (i32, i32) {
    %c0_i32 = arith.constant 0 : i32
    %c0_i32_0 = arith.constant 0 : i32
    return %arg0, %c0_i32 : i32, i32
  }
  func.func @transform_1(%arg0: i32, %arg1: i32) -> (i32, i32) {
    %c0_i32 = arith.constant 0 : i32
    %c0_i32_0 = arith.constant 0 : i32
    return %c0_i32, %arg1 : i32, i32
  }
  func.func @transform_2(%arg0: i32, %arg1: i32) -> (i32, i32) {
    %c0_i32 = arith.constant 0 : i32
    %c0_i32_0 = arith.constant 0 : i32
    return %c0_i32, %arg1 : i32, i32
  }
  func.func @transform_3(%arg0: i32, %arg1: i32) -> (i32, i32) {
    %c0_i32 = arith.constant 0 : i32
    %c0_i32_0 = arith.constant 0 : i32
    return %c0_i32, %arg1 : i32, i32
  }
  func.func @transform_4(%arg0: i32, %arg1: i32) -> (i32, i32) {
    %c0_i32 = arith.constant 0 : i32
    %c0_i32_0 = arith.constant 0 : i32
    return %c0_i32, %arg1 : i32, i32
  }
  func.func @transform_5(%arg0: i32, %arg1: i32) -> (i32, i32) {
    %c0_i32 = arith.constant 0 : i32
    %c0_i32_0 = arith.constant 0 : i32
    return %arg1, %c0_i32 : i32, i32
  }
  func.func @transform_6(%arg0: i32, %arg1: i32) -> (i32, i32) {
    %c0_i32 = arith.constant 0 : i32
    %c0_i32_0 = arith.constant 0 : i32
    %c0_i32_1 = arith.constant 0 : i32
    return %c0_i32, %c0_i32_0 : i32, i32
  }
  func.func @transform_7(%arg0: i32, %arg1: i32) -> (i32, i32) {
    %c0_i32 = arith.constant 0 : i32
    %c0_i32_0 = arith.constant 0 : i32
    return %arg0, %c0_i32 : i32, i32
  }
}

</mosaic_0001>

<bundles_post_ra>
// kernel: tpu_custom_call.1
= control target key start
LH: loop header
LB: loop body
LE: loop exit
PB: predicated region body
PF: predicated region fallthrough
CT: control target
= control target key end

     0   :  { %vm31_vm0 = vcmask 261120   ;;  %s630_s0 = inlined_call_operand.vmem [shape: f32[16,32], index: 0, kind: input, shape index: {}]   ;;  %s631_s1 = inlined_call_operand.vmem [shape: f32[32,64], index: 1, kind: input, shape index: {}]   ;;  %s632_s2 = inlined_call_operand.vmem [shape: f32[1,64], index: 2, kind: input, shape index: {}]   ;;  %s633_s3 = inlined_call_operand.vmem [shape: f32[32,64], index: 3, kind: input, shape index: {}]   ;;  %s634_s4 = inlined_call_operand.vmem [shape: f32[1,64], index: 4, kind: input, shape index: {}]   ;;  %s635_s5 = inlined_call_operand.vmem [shape: f32[64,32], index: 5, kind: input, shape index: {}]   ;;  %s636_s6 = inlined_call_operand.vmem [shape: f32[1,32], index: 6, kind: input, shape index: {}]   ;;  %s637_s7 = inlined_call_operand.hbm [shape: f32[16,32], index: 7, kind: output, shape index: {}]  }
   0x1   :  { %v36_v0 = vld [vmem:[%s631_s1] sm:$0xff]  ;;  %v37_v1 = vld [vmem:[%s631_s1 + $0x8] sm:$0xff]  ;;  %v38_v2 = vld [vmem:[%s631_s1 + $0x10] sm:$0xff] }
   0x2   :  { %v433_v3 = vpack.c.bf16 %v37_v1, %v36_v0  ;;  %v39_v4 = vld [vmem:[%s631_s1 + $0x18] sm:$0xff]  ;;  %v34_v5 = vld [vmem:[%s630_s0] sm:$0xff]  ;;  %v130_v8 = vld [vmem:[%s633_s3 + $0x8] sm:$0xff] }
   0x3   :  { %v437_v6 = vpack.c.bf16 %v39_v4, %v38_v2  ;;  %400 = vmatprep.mubr.msk.f32.mxu1 %vm31_vm0, %v34_v5  ;;  %v129_v7 = vld [vmem:[%s633_s3] sm:$0xff] }
   0x4   :  { %434 = vmatprep.subr.bf16.mxu1 %v433_v3 }
   0x5   :  { %12 = vsyncpa [#allocation4], 0  ;;  %436 = vmatpush3.bf16.msra.mxu1 %v433_v3  ;;  %v441_v9 = vpack.c.bf16 %v130_v8, %v129_v7  ;;  %v131_v10 = vld [vmem:[%s633_s3 + $0x10] sm:$0xff]  ;;  %v132_v11 = vld [vmem:[%s633_s3 + $0x18] sm:$0xff]  ;;  %v501_v26 = vmov 0.0   ;;  %vm241_vm1 = vcmask 523264  }
   0x6   :  { %438 = vmatprep.subr.bf16.mxu1 %v437_v6  ;;  %v35_v12 = vld [vmem:[%s630_s0 + $0x8] sm:$0xff]  ;;  %v445_v13 = vpack.c.bf16 %v132_v11, %v131_v10  ;;  %v233_v14 = vld [vmem:[%s635_s5] sm:$0xff]  ;;  %v235_v17 = vld [vmem:[%s635_s5 + $0x10] sm:$0xff]  ;;  %33 = vst.msk [vmem:[#allocation2 + $0x8] sm:$0xff] %vm31_vm0, %v501_v26  ;;  %s502_s14 = smov [#allocation3]  }
   0x7   :  { %v234_v15 = vld [vmem:[%s635_s5 + $0x8] sm:$0xff]  ;;  %v236_v18 = vld [vmem:[%s635_s5 + $0x18] sm:$0xff]  ;;  %v237_v20 = vld [vmem:[%s635_s5 + $0x20] sm:$0xff]  ;;  %32 = vst.msk [vmem:[#allocation2] sm:$0xff] %vm31_vm0, %v501_v26  ;;  %s348_s1 = sshll.u32 %s502_s14, 4  ;;  %s349_s1 = int_to_ptr.vmem [resolvable:$true] %s348_s1 }
   0x8   :  { %v449_v16 = vpack.c.bf16 %v234_v15, %v233_v14  ;;  %v453_v19 = vpack.c.bf16 %v236_v18, %v235_v17  ;;  %v238_v21 = vld [vmem:[%s635_s5 + $0x28] sm:$0xff]  ;;  %v239_v23 = vld [vmem:[%s635_s5 + $0x30] sm:$0xff]  ;;  %v240_v24 = vld [vmem:[%s635_s5 + $0x38] sm:$0xff]  ;;  %s477_s15 = scalar_lea.vmem %s349_s1, 256  ;;  %p482_p1 = scmp.lt.s32.totalorder %s349_s1, %s349_s1 }
   0x9   :  { %440 = vmatpush3.bf16.msra.mxu1 %v437_v6  ;;  %v457_v22 = vpack.c.bf16 %v238_v21, %v237_v20  ;;  %v461_v25 = vpack.c.bf16 %v240_v24, %v239_v23  ;;  %v359_v27 = vld [vmem:[%s632_s2] ss:$0 sm:$0xff]  ;;  %p478_p0 = scmp.ne.s32.totalorder %s349_s1, %s477_s15  ;;  %p483_p2 = scmp.lt.s32.totalorder %s477_s15, %s477_s15 }
   0xa   :  { %442 = vmatprep.subr.bf16.mxu1 %v441_v9  ;;  %450 = vmatprep.subr.bf16.mxu0 %v449_v16  ;;  %v362_v40 = vld [vmem:[%s634_s4] ss:$0 sm:$0xff] }
   0xb   :  { %452 = vmatpush3.bf16.msra.mxu0 %v449_v16  ;;  %v369_v55 = vld [vmem:[%s636_s6] ss:$0 sm:$0xff]  ;;  %p484_p3 = por %p483_p2, %p482_p1 }
   0xc   :  { %401 = vmatmul.mubr.msk.f32.vlgmr.msra.gmra.mrb[0].mxu1 %vm31_vm0, %v35_v12  ;;  %454 = vmatprep.subr.bf16.mxu0 %v453_v19 }
   0xd   :  { %444 = vmatpush3.bf16.msra.mxu1 %v441_v9  ;;  %411 = vmatprep.mubr.msk.f32.mxu1 %vm31_vm0, %v34_v5  ;;  %v232_v49 = vld [vmem:[#allocation2 + $0x8] sm:$0xff]  ;;  %p485_p4 = pnand %p484_p3, %p478_p0 }
   0xe   :  { %446 = vmatprep.subr.bf16.mxu1 %v445_v13  ;;  %v231_v50 = vld [vmem:[#allocation2] sm:$0xff] }
   0xf   :  { %456 = vmatpush3.bf16.msra.mxu0 %v453_v19 }
  0x10   :  { %458 = vmatprep.subr.bf16.mxu0 %v457_v22 }
  0x11   :  { %448 = vmatpush3.bf16.msra.mxu1 %v445_v13 }
  0x13   :  { %460 = vmatpush3.bf16.msra.mxu0 %v457_v22 }
  0x14   :  { %412 = vmatmul.mubr.msk.f32.vlgmr.msra.gmra.mrb[2].mxu1 %vm31_vm0, %v35_v12  ;;  %462 = vmatprep.subr.bf16.mxu0 %v461_v25 }
  0x17   :  { %464 = vmatpush3.bf16.msra.mxu0 %v461_v25 }
  0xdf   :  { %v402_v28 = vpop.f32.mrb[0].mxu1 }
  0xe0   :  { %v126_v29 = vadd.f32 %v402_v28, %v359_v27  ;;  %v120_v30 = vpop.f32.mrb[1].mxu1 }
  0xe1   :  { %v121_v31 = vadd.f32 %v359_v27, %v120_v30 }
  0xe2   :  { %v366_v32 = vmul.f32 -1.442695, %v126_v29 }
  0xe3   :  { %v365_v33 = vmul.f32 -1.442695, %v121_v31 }
  0xe4   :  { %469 = vpow2.f32 %v366_v32 }
  0xe5   :  { %471 = vpow2.f32 %v365_v33 }
  0xe7   :  { %v413_v34 = vpop.f32.mrb[2].mxu1 }
  0xe8   :  { %v206_v35 = vpop.f32.mrb[3].mxu1  ;;  %v212_v41 = vadd.f32 %v413_v34, %v362_v40 }
  0xe9   :  { %v207_v43 = vadd.f32 %v362_v40, %v206_v35 }
  0xee   :  { %v470_v36 = vpop.eup %469 }
  0xef   :  { %v472_v37 = vpop.eup %471  ;;  %v222_v38 = vadd.f32 1.0, %v470_v36 }
  0xf0   :  { %v221_v39 = vadd.f32 1.0, %v472_v37 }
  0xf1   :  { %473 = vrcp.f32 %v222_v38 }
  0xf2   :  { %475 = vrcp.f32 %v221_v39 }
  0xfb   :  { %v474_v42 = vpop.eup %473 }
  0xfc   :  { %v476_v44 = vpop.eup %475  ;;  %v228_v45 = vmul.f32 %v474_v42, %v126_v29 }
  0xfd   :  { %v227_v46 = vmul.f32 %v476_v44, %v121_v31 }
  0xfe   :  { %v230_v47 = vmul.f32 %v228_v45, %v212_v41 }
  0xff   :  { %v229_v48 = vmul.f32 %v227_v46, %v207_v43 }
 0x101   :  { %430 = vmatprep.mubr.msk.f32.mxu0 %vm241_vm1, %v229_v48 }
 0x102   :  { %431 = vmatmul.mubr.msk.f32.vlgmr.msra.gmra.mrb[0].mxu0 %vm241_vm1, %v230_v47 }
 0x1d5   :  { %v432_v51 = vpop.f32.mrb[0].mxu0 }
 0x1d6   :  { %v324_v52 = vadd.f32 %v432_v51, %v232_v49  ;;  %v314_v53 = vpop.f32.mrb[1].mxu0 }
 0x1d7   :  { %v323_v54 = vadd.f32 %v314_v53, %v231_v50 }
 0x1d8   :  { %326 = vst.msk [vmem:[#allocation2 + $0x8] sm:$0xff] %vm31_vm0, %v324_v52 }
 0x1d9   :  { %325 = vst.msk [vmem:[#allocation2] sm:$0xff] %vm31_vm0, %v323_v54 }
 0x1df   :  { %v331_v56 = vld [vmem:[#allocation2 + $0x8] sm:$0xff] }
 0x1e0   :  { %v330_v57 = vld [vmem:[#allocation2] sm:$0xff]  ;;  %v340_v58 = vadd.f32 %v369_v55, %v331_v56 }
 0x1e1   :  { %v339_v59 = vadd.f32 %v369_v55, %v330_v57 }
 0x1e2   :  { %342 = vst.msk [vmem:[#allocation3 + $0x8] sm:$0xff] %vm31_vm0, %v340_v58 }
 0x1e3   :  { %341 = vst.msk [vmem:[#allocation3] sm:$0xff] %vm31_vm0, %v339_v59 }
 0x1e4   :  { %488 = shalt.err (!%p485_p4)
}
 0x1e5   :  { %s489_s17 = scalar_lea.hbm %s637_s7, 256 }
 0x1e6   :  { %p490_p5 = scmp.ne.s32.totalorder %s637_s7, %s489_s17  ;;  %p493_p6 = scmp.lt.u32.totalorder %s489_s17, %s637_s7 }
 0x1e8   :  { %p495_p7 = pnand %p493_p6, %p490_p5 }
 0x1ea   :  { %498 = shalt.err (!%p495_p7)
}
 0x1eb   :  { %s503_s3 = smov 128   ;;  %s504_s22 = smov 8  }
 0x1ec   :  { %354 = dma.vmem_to_hbm [thread:$0]  %s349_s1, 256, %s637_s7, [#allocation4], %s503_s3, %s503_s3, %s504_s22  }
 0x1ed   :  { %499 = dma.done.wait [#allocation4], 256  }
 0x1ee   :  { %500 = vsyncadd [#allocation4], 4294967040 }
 0x1ef   :  { %358 = vsyncpa [#allocation4], 1 }

</bundles_post_ra>
